<compile_context>
chip_gen: v6e
topology: v6e:2x2x1
jax: 0.10.0
libtpu: 0.0.40
codegen_flags: <defaults>
</compile_context>

<pallas_src>
import functools

import jax
import jax.numpy as jnp
import numpy as np
from jax.experimental import pallas as pl
from jax.experimental.pallas import tpu as pltpu

VMEM_LIMIT_BYTES = 48 * 1024 * 1024  # > v5e/v6e scoped defaults, < v7x 64 MiB physical


def _round_up(x, m):
    return ((x + m - 1) // m) * m


# ----------------------------- Linear kernel --------------------------------
def _linear_kernel(x_ref, wt_ref, b_ref, o_ref):
    # x: (TM, Din), wt: (Din, Dout) resident, b: (1, Dout)
    o_ref[...] = (
        jnp.dot(x_ref[...], wt_ref[...], preferred_element_type=jnp.float32)
        + b_ref[...]
    )


def linear(x, wt, b2d, *, row_tile=512):
    """x: (N, Din); wt: (Din, Dout) pre-transposed; b2d: (1, Dout)."""
    n, din = x.shape
    dout = wt.shape[1]
    tm = min(row_tile, _round_up(n, 8))
    n_pad = _round_up(n, tm)
    if n_pad != n:
        x = jnp.pad(x, ((0, n_pad - n), (0, 0)))
    y = pl.pallas_call(
        _linear_kernel,
        out_shape=jax.ShapeDtypeStruct((n_pad, dout), jnp.float32),
        grid=(n_pad // tm,),
        in_specs=[
            pl.BlockSpec((tm, din), lambda i: (i, 0)),
            pl.BlockSpec((din, dout), lambda i: (0, 0)),   # weight stays resident
            pl.BlockSpec((1, dout), lambda i: (0, 0)),
        ],
        out_specs=pl.BlockSpec((tm, dout), lambda i: (i, 0)),
        compiler_params=pltpu.CompilerParams(
            dimension_semantics=("parallel",),
            vmem_limit_bytes=VMEM_LIMIT_BYTES),
    )(x, wt, b2d)
    return y[:n] if n_pad != n else y


# ----------- Pass 1: per-batch max of (already scaled) Q @ K^T --------------
def _qk_max_kernel(q_ref, k_ref, gmax_ref):
    # q_ref: (1, H, T, Dh)   k_ref: (1, H, S, Dh)   (scale folded into weights)
    w = jnp.einsum("htd,hsd->hts", q_ref[0], k_ref[0],
                   preferred_element_type=jnp.float32)
    gmax_ref[...] = jnp.maximum(
        jnp.full((1, 1, 1), -jnp.inf, dtype=jnp.float32), jnp.max(w))


# --- Pass 2: scores + both softmaxes + both bmm's + fused output projection --
def _attn_kernel(gmax_ref, q_ref, k_ref, vs_ref, vi_ref,
                 wos_ref, bos_ref, woi_ref, boi_ref,
                 os_ref, oi_ref):
    h = pl.program_id(1)
    g = gmax_ref[0, 0]          # global max scalar from SMEM

    q = q_ref[0, 0]             # (T, Dh)  (scale pre-folded)
    k = k_ref[0, 0]             # (S, Dh)
    vs = vs_ref[0, 0]           # (T, Dh)
    vi = vi_ref[0, 0]           # (S, Dh)

    w = jax.lax.dot_general(q, k, (((1,), (1,)), ((), ())),
                            preferred_element_type=jnp.float32)      # (T, S)
    # After subtracting the global max all values are <= 0, so the +50000 clamp
    # of the reference can never fire; only the lower clamp is kept.
    w = jnp.maximum(w - g, -50000.0)

    # --- s branch: row softmax over src (lane axis) ---
    rmax = jnp.max(w, axis=-1, keepdims=True)
    e_s = jnp.exp(w - rmax)
    p_s = e_s / jnp.sum(e_s, axis=-1, keepdims=True)                 # (T, S)

    # --- i branch: column softmax over tgt (== transposed row softmax) ---
    cmax = jnp.max(w, axis=0, keepdims=True)                         # (1, S)
    e_i = jnp.exp(jnp.maximum(w - cmax, -50000.0))                   # lower clamp = no-op, kept for parity
    p_i = e_i / jnp.sum(e_i, axis=0, keepdims=True)                  # (T, S) == probs_i^T

    os_h = jnp.dot(p_s, vi, preferred_element_type=jnp.float32)      # (T, Dh)
    oi_h = jax.lax.dot_general(p_i, vs, (((0,), (0,)), ((), ())),
                               preferred_element_type=jnp.float32)   # (S, Dh)

    # Fused "from_heads" + output projection: per-head partial products are
    # accumulated straight into the resident output blocks (no concat, no HBM
    # round trip of the (T,E)/(S,E) attention outputs, no separate linear call).
    ds = jnp.dot(os_h, wos_ref[0], preferred_element_type=jnp.float32)   # (T, s_dim)
    di = jnp.dot(oi_h, woi_ref[0], preferred_element_type=jnp.float32)   # (S, i_dim)

    @pl.when(h == 0)
    def _():
        os_ref[0] = bos_ref[...] + ds
        oi_ref[0] = boi_ref[...] + di

    @pl.when(h > 0)
    def _():
        os_ref[0] = os_ref[0] + ds
        oi_ref[0] = oi_ref[0] + di


# ------------------------------ param prep -----------------------------------
def prepare_params(params, *, num_heads):
    """Fold scale into q-proj, fuse (q,v_s)/(k,v_i) projections, head-major out weights."""
    E = params["s_proj_w"].shape[0]
    Dh = E // num_heads
    scale = float(Dh) ** (-0.5)

    w_q = params["s_proj_w"] * scale          # fold softmax scale (linear => exact)
    b_q = params["s_proj_b"] * scale
    w_s = jnp.concatenate([w_q, params["vs_proj_w"]], axis=0)          # (2E, s_dim)
    b_s = jnp.concatenate([b_q, params["vs_proj_b"]], axis=0)
    w_i = jnp.concatenate([params["i_proj_w"], params["vi_proj_w"]], axis=0)   # (2E, i_dim)
    b_i = jnp.concatenate([params["i_proj_b"], params["vi_proj_b"]], axis=0)

    s_dim = params["out_s_w"].shape[0]
    i_dim = params["out_i_w"].shape[0]
    return {
        "in_s_wt": w_s.T, "in_s_b": b_s.reshape(1, -1),
        "in_i_wt": w_i.T, "in_i_b": b_i.reshape(1, -1),
        # head-major output-projection weights: (H, Dh, out_dim)
        "out_s_wt": params["out_s_w"].T.reshape(num_heads, Dh, s_dim),
        "out_s_b": params["out_s_b"].reshape(1, -1),
        "out_i_wt": params["out_i_w"].T.reshape(num_heads, Dh, i_dim),
        "out_i_b": params["out_i_b"].reshape(1, -1),
    }


# ------------------------------ full forward ---------------------------------
def state_mha_forward(s, i_feat, prepared, *, num_heads):
    tgt_len, bsz, s_dim = s.shape
    src_len, _, i_dim = i_feat.shape
    two_e = prepared["in_s_wt"].shape[1]
    embed_dim = two_e // 2
    head_dim = embed_dim // num_heads

    s_b = jnp.transpose(s, (1, 0, 2)).reshape(bsz * tgt_len, s_dim)
    i_b = jnp.transpose(i_feat, (1, 0, 2)).reshape(bsz * src_len, i_dim)

    # Fused input projections: one row-tiled linear per input stream.
    qvs = linear(s_b, prepared["in_s_wt"], prepared["in_s_b"])   # (bsz*T, 2E)
    kvi = linear(i_b, prepared["in_i_wt"], prepared["in_i_b"])   # (bsz*S, 2E)

    # Head-major layout plumbing (XLA): (bsz, H, L, Dh) so kernels index heads
    # on a leading axis instead of slicing across the 128-lane axis.
    qvs = qvs.reshape(bsz, tgt_len, 2, num_heads, head_dim).transpose(2, 0, 3, 1, 4)
    kvi = kvi.reshape(bsz, src_len, 2, num_heads, head_dim).transpose(2, 0, 3, 1, 4)
    q_h, vs_h = qvs[0], qvs[1]            # (bsz, H, T, Dh)
    k_h, vi_h = kvi[0], kvi[1]            # (bsz, H, S, Dh)

    # Pass 1: per-batch max of scaled scores (stable_softmax_2d), batch-parallel,
    # only q/k halves DMA'd; tiny external reduce gives the global max.
    per_b_max = pl.pallas_call(
        _qk_max_kernel,
        out_shape=jax.ShapeDtypeStruct((bsz, 1, 1), jnp.float32),
        grid=(bsz,),
        in_specs=[
            pl.BlockSpec((1, num_heads, tgt_len, head_dim), lambda b: (b, 0, 0, 0)),
            pl.BlockSpec((1, num_heads, src_len, head_dim), lambda b: (b, 0, 0, 0)),
        ],
        out_specs=pl.BlockSpec((1, 1, 1), lambda b: (b, 0, 0)),
        compiler_params=pltpu.CompilerParams(
            dimension_semantics=("parallel",),
            vmem_limit_bytes=VMEM_LIMIT_BYTES),
    )(q_h, k_h)
    gmax = jnp.max(per_b_max).reshape(1, 1)

    # Pass 2: attention + fused from_heads/output projection.  Grid (bsz, heads):
    # batch parallel (megacore), head axis accumulates into the resident output block.
    out_s_b, out_i_b = pl.pallas_call(
        _attn_kernel,
        out_shape=(
            jax.ShapeDtypeStruct((bsz, tgt_len, s_dim), jnp.float32),
            jax.ShapeDtypeStruct((bsz, src_len, i_dim), jnp.float32),
        ),
        grid=(bsz, num_heads),
        in_specs=[
            pl.BlockSpec(memory_space=pltpu.MemorySpace.SMEM),                      # gmax (1,1)
            pl.BlockSpec((1, 1, tgt_len, head_dim), lambda b, h: (b, h, 0, 0)),     # q
            pl.BlockSpec((1, 1, src_len, head_dim), lambda b, h: (b, h, 0, 0)),     # k
            pl.BlockSpec((1, 1, tgt_len, head_dim), lambda b, h: (b, h, 0, 0)),     # v_s
            pl.BlockSpec((1, 1, src_len, head_dim), lambda b, h: (b, h, 0, 0)),     # v_i
            pl.BlockSpec((1, head_dim, s_dim), lambda b, h: (h, 0, 0)),             # W_out_s head h
            pl.BlockSpec((1, s_dim), lambda b, h: (0, 0)),                          # b_out_s
            pl.BlockSpec((1, head_dim, i_dim), lambda b, h: (h, 0, 0)),             # W_out_i head h
            pl.BlockSpec((1, i_dim), lambda b, h: (0, 0)),                          # b_out_i
        ],
        out_specs=(
            pl.BlockSpec((1, tgt_len, s_dim), lambda b, h: (b, 0, 0)),
            pl.BlockSpec((1, src_len, i_dim), lambda b, h: (b, 0, 0)),
        ),
        compiler_params=pltpu.CompilerParams(
            dimension_semantics=("parallel", "arbitrary"),
            vmem_limit_bytes=VMEM_LIMIT_BYTES),
    )(gmax, q_h, k_h, vs_h, vi_h,
      prepared["out_s_wt"], prepared["out_s_b"],
      prepared["out_i_wt"], prepared["out_i_b"])

    return jnp.transpose(out_s_b, (1, 0, 2)), jnp.transpose(out_i_b, (1, 0, 2))


# ------------------------------- reference ----------------------------------
def reference_forward(s, i_feat, params, num_heads):
    T, B, s_dim = s.shape
    S = i_feat.shape[0]
    E = params["s_proj_w"].shape[0]
    Dh = E // num_heads
    scale = Dh ** (-0.5)
    sb = jnp.transpose(s, (1, 0, 2))
    ib = jnp.transpose(i_feat, (1, 0, 2))

    def lin(x, w, b):
        return x @ w.T + b

    q = lin(sb, params["s_proj_w"], params["s_proj_b"]) * scale
    k = lin(ib, params["i_proj_w"], params["i_proj_b"])
    vs = lin(sb, params["vs_proj_w"], params["vs_proj_b"])
    vi = lin(ib, params["vi_proj_w"], params["vi_proj_b"])

    def shp(x, L):
        return (x.reshape(B, L, num_heads, Dh).transpose(0, 2, 1, 3)
                 .reshape(B * num_heads, L, Dh))

    q, k, vs, vi = shp(q, T), shp(k, S), shp(vs, T), shp(vi, S)
    aw = jnp.einsum("btd,bsd->bts", q, k)
    aw = aw - jnp.max(aw)
    aw = jnp.clip(aw, -50000.0, 50000.0)
    awT = jnp.swapaxes(aw, 1, 2)
    awi = awT - jnp.max(awT, axis=-1, keepdims=True)
    awi = jnp.clip(awi, -50000.0, 50000.0)
    awi = jax.nn.softmax(awi, axis=-1)
    aws = jax.nn.softmax(aw, axis=-1)
    aos = jnp.einsum("bts,bsd->btd", aws, vi)
    aoi = jnp.einsum("bst,btd->bsd", awi, vs)

    def unshp(x, L):
        return (x.reshape(B, num_heads, L, Dh).transpose(0, 2, 1, 3)
                 .reshape(B, L, E))

    aos = lin(unshp(aos, T), params["out_s_w"], params["out_s_b"])
    aoi = lin(unshp(aoi, S), params["out_i_w"], params["out_i_b"])
    return jnp.transpose(aos, (1, 0, 2)), jnp.transpose(aoi, (1, 0, 2))


# --------------------------------- main --------------------------------------
def xavier_uniform(key, out_dim, in_dim):
    a = (6.0 / (in_dim + out_dim)) ** 0.5
    return jax.random.uniform(key, (out_dim, in_dim), jnp.float32, -a, a)


if __name__ == "__main__":
    s_dim, i_dim, embed_dim, num_heads = 16, 24, 32, 4
    tgt_len, src_len, bsz = 8, 12, 2

    key = jax.random.PRNGKey(0)
    keys = jax.random.split(key, 8)
    params = {
        "s_proj_w": xavier_uniform(keys[0], embed_dim, s_dim),
        "s_proj_b": jnp.zeros((embed_dim,), jnp.float32),
        "i_proj_w": xavier_uniform(keys[1], embed_dim, i_dim),
        "i_proj_b": jnp.zeros((embed_dim,), jnp.float32),
        "vs_proj_w": xavier_uniform(keys[2], embed_dim, s_dim),
        "vs_proj_b": jnp.zeros((embed_dim,), jnp.float32),
        "vi_proj_w": xavier_uniform(keys[3], embed_dim, i_dim),
        "vi_proj_b": jnp.zeros((embed_dim,), jnp.float32),
        "out_s_w": xavier_uniform(keys[4], s_dim, embed_dim),
        "out_s_b": jnp.zeros((s_dim,), jnp.float32),
        "out_i_w": xavier_uniform(keys[5], i_dim, embed_dim),
        "out_i_b": jnp.zeros((i_dim,), jnp.float32),
    }
    prepared = prepare_params(params, num_heads=num_heads)

    s = jax.random.normal(keys[6], (tgt_len, bsz, s_dim), jnp.float32)
    i_feat = jax.random.normal(keys[7], (src_len, bsz, i_dim), jnp.float32)

    fwd = jax.jit(functools.partial(state_mha_forward, num_heads=num_heads))
    out_s, out_i = fwd(s, i_feat, prepared)
    jax.block_until_ready((out_s, out_i))

    ref_s, ref_i = reference_forward(s, i_feat, params, num_heads)
    np.testing.assert_allclose(np.array(out_s), np.array(ref_s), rtol=1e-4, atol=1e-4)
    np.testing.assert_allclose(np.array(out_i), np.array(ref_i), rtol=1e-4, atol=1e-4)

    print("KERNEL_OK")
</pallas_src>

<mosaic_0001>
module attributes {stable_mosaic.version = 11 : i64} {
  func.func @_linear_kernel(%arg0: i32, %arg1: memref<24x24xf32, #tpu.memory_space<vmem>>, %arg2: memref<24x64xf32, #tpu.memory_space<vmem>>, %arg3: memref<1x64xf32, #tpu.memory_space<vmem>>, %arg4: memref<24x64xf32, #tpu.memory_space<vmem>>) attributes {dimension_semantics = [#tpu.dimension_semantics<parallel>], iteration_bounds = array<i64: 1>, scalar_prefetch = 0 : i64, scratch_operands = 0 : i64, tpu.core_type = #tpu.core_type<tc>, window_params = [{transform_indices = @transform_0, window_bounds = array<i64: 24, 24>}, {pipeline_mode = #tpu.pipeline_mode<synchronous>, transform_indices = @transform_1, window_bounds = array<i64: 24, 64>}, {pipeline_mode = #tpu.pipeline_mode<synchronous>, transform_indices = @transform_2, window_bounds = array<i64: 1, 64>}, {transform_indices = @transform_3, window_bounds = array<i64: 24, 64>}]} {
    %c0 = arith.constant 0 : index
    %c0_0 = arith.constant 0 : index
    %0 = vector.load %arg1[%c0, %c0_0] : memref<24x24xf32, #tpu.memory_space<vmem>>, vector<24x24xf32>
    %c0_1 = arith.constant 0 : index
    %c0_2 = arith.constant 0 : index
    %1 = vector.load %arg2[%c0_1, %c0_2] : memref<24x64xf32, #tpu.memory_space<vmem>>, vector<24x64xf32>
    %cst = arith.constant dense<0.000000e+00> : vector<24x64xf32>
    %2 = tpu.matmul %0, %1, %cst {dimension_numbers = #tpu.dot_dimension_numbers<[1], [0], [0], [1], [0, 0, 1, 1], [], []>} : vector<24x24xf32>, vector<24x64xf32>, vector<24x64xf32> -> vector<24x64xf32>
    %c0_3 = arith.constant 0 : index
    %c0_4 = arith.constant 0 : index
    %3 = vector.load %arg3[%c0_3, %c0_4] : memref<1x64xf32, #tpu.memory_space<vmem>>, vector<1x64xf32>
    %4 = vector.broadcast %3 : vector<1x64xf32> to vector<24x64xf32>
    %5 = arith.addf %2, %4 : vector<24x64xf32>
    %c0_5 = arith.constant 0 : index
    %c0_6 = arith.constant 0 : index
    %6 = vector.load %arg4[%c0_5, %c0_6] : memref<24x64xf32, #tpu.memory_space<vmem>>, vector<24x64xf32>
    tpu.vector_store %arg4[%c0_5, %c0_6], %5 {strides = array<i32>} : memref<24x64xf32, #tpu.memory_space<vmem>>, vector<24x64xf32>,
    return
  }
  func.func @transform_0(%arg0: i32) -> (i32, i32) {
    %c0_i32 = arith.constant 0 : i32
    %c0_i32_0 = arith.constant 0 : i32
    return %arg0, %c0_i32 : i32, i32
  }
  func.func @transform_1(%arg0: i32) -> (i32, i32) {
    %c0_i32 = arith.constant 0 : i32
    %c0_i32_0 = arith.constant 0 : i32
    %c0_i32_1 = arith.constant 0 : i32
    return %c0_i32, %c0_i32_0 : i32, i32
  }
  func.func @transform_2(%arg0: i32) -> (i32, i32) {
    %c0_i32 = arith.constant 0 : i32
    %c0_i32_0 = arith.constant 0 : i32
    %c0_i32_1 = arith.constant 0 : i32
    return %c0_i32, %c0_i32_0 : i32, i32
  }
  func.func @transform_3(%arg0: i32) -> (i32, i32) {
    %c0_i32 = arith.constant 0 : i32
    %c0_i32_0 = arith.constant 0 : i32
    return %arg0, %c0_i32 : i32, i32
  }
}

module attributes {stable_mosaic.version = 11 : i64} {
  func.func @_linear_kernel(%arg0: i32, %arg1: memref<16x16xf32, #tpu.memory_space<vmem>>, %arg2: memref<16x64xf32, #tpu.memory_space<vmem>>, %arg3: memref<1x64xf32, #tpu.memory_space<vmem>>, %arg4: memref<16x64xf32, #tpu.memory_space<vmem>>) attributes {dimension_semantics = [#tpu.dimension_semantics<parallel>], iteration_bounds = array<i64: 1>, scalar_prefetch = 0 : i64, scratch_operands = 0 : i64, tpu.core_type = #tpu.core_type<tc>, window_params = [{transform_indices = @transform_0, window_bounds = array<i64: 16, 16>}, {pipeline_mode = #tpu.pipeline_mode<synchronous>, transform_indices = @transform_1, window_bounds = array<i64: 16, 64>}, {pipeline_mode = #tpu.pipeline_mode<synchronous>, transform_indices = @transform_2, window_bounds = array<i64: 1, 64>}, {transform_indices = @transform_3, window_bounds = array<i64: 16, 64>}]} {
    %c0 = arith.constant 0 : index
    %c0_0 = arith.constant 0 : index
    %0 = vector.load %arg1[%c0, %c0_0] : memref<16x16xf32, #tpu.memory_space<vmem>>, vector<16x16xf32>
    %c0_1 = arith.constant 0 : index
    %c0_2 = arith.constant 0 : index
    %1 = vector.load %arg2[%c0_1, %c0_2] : memref<16x64xf32, #tpu.memory_space<vmem>>, vector<16x64xf32>
    %cst = arith.constant dense<0.000000e+00> : vector<16x64xf32>
    %2 = tpu.matmul %0, %1, %cst {dimension_numbers = #tpu.dot_dimension_numbers<[1], [0], [0], [1], [0, 0, 1, 1], [], []>} : vector<16x16xf32>, vector<16x64xf32>, vector<16x64xf32> -> vector<16x64xf32>
    %c0_3 = arith.constant 0 : index
    %c0_4 = arith.constant 0 : index
    %3 = vector.load %arg3[%c0_3, %c0_4] : memref<1x64xf32, #tpu.memory_space<vmem>>, vector<1x64xf32>
    %4 = vector.broadcast %3 : vector<1x64xf32> to vector<16x64xf32>
    %5 = arith.addf %2, %4 : vector<16x64xf32>
    %c0_5 = arith.constant 0 : index
    %c0_6 = arith.constant 0 : index
    %6 = vector.load %arg4[%c0_5, %c0_6] : memref<16x64xf32, #tpu.memory_space<vmem>>, vector<16x64xf32>
    tpu.vector_store %arg4[%c0_5, %c0_6], %5 {strides = array<i32>} : memref<16x64xf32, #tpu.memory_space<vmem>>, vector<16x64xf32>,
    return
  }
  func.func @transform_0(%arg0: i32) -> (i32, i32) {
    %c0_i32 = arith.constant 0 : i32
    %c0_i32_0 = arith.constant 0 : i32
    return %arg0, %c0_i32 : i32, i32
  }
  func.func @transform_1(%arg0: i32) -> (i32, i32) {
    %c0_i32 = arith.constant 0 : i32
    %c0_i32_0 = arith.constant 0 : i32
    %c0_i32_1 = arith.constant 0 : i32
    return %c0_i32, %c0_i32_0 : i32, i32
  }
  func.func @transform_2(%arg0: i32) -> (i32, i32) {
    %c0_i32 = arith.constant 0 : i32
    %c0_i32_0 = arith.constant 0 : i32
    %c0_i32_1 = arith.constant 0 : i32
    return %c0_i32, %c0_i32_0 : i32, i32
  }
  func.func @transform_3(%arg0: i32) -> (i32, i32) {
    %c0_i32 = arith.constant 0 : i32
    %c0_i32_0 = arith.constant 0 : i32
    return %arg0, %c0_i32 : i32, i32
  }
}

module attributes {stable_mosaic.version = 11 : i64} {
  func.func @_qk_max_kernel(%arg0: i32, %arg1: memref<1x4x8x8xf32, #tpu.memory_space<vmem>>, %arg2: memref<1x4x12x8xf32, #tpu.memory_space<vmem>>, %arg3: memref<1x1x1xf32, #tpu.memory_space<vmem>>) attributes {dimension_semantics = [#tpu.dimension_semantics<parallel>], iteration_bounds = array<i64: 2>, scalar_prefetch = 0 : i64, scratch_operands = 0 : i64, tpu.core_type = #tpu.core_type<tc>, window_params = [{transform_indices = @transform_0, window_bounds = array<i64: 1, 4, 8, 8>}, {transform_indices = @transform_1, window_bounds = array<i64: 1, 4, 12, 8>}, {transform_indices = @transform_2, window_bounds = array<i64: 1, 1, 1>}]} {
    %c0 = arith.constant 0 : index
    %c0_0 = arith.constant 0 : index
    %c0_1 = arith.constant 0 : index
    %c0_2 = arith.constant 0 : index
    %0 = vector.load %arg1[%c0, %c0_0, %c0_1, %c0_2] : memref<1x4x8x8xf32, #tpu.memory_space<vmem>>, vector<1x4x8x8xf32>
    %1 = vector.shape_cast %0 : vector<1x4x8x8xf32> to vector<4x8x8xf32>
    %c0_3 = arith.constant 0 : index
    %c0_4 = arith.constant 0 : index
    %c0_5 = arith.constant 0 : index
    %c0_6 = arith.constant 0 : index
    %2 = vector.load %arg2[%c0_3, %c0_4, %c0_5, %c0_6] : memref<1x4x12x8xf32, #tpu.memory_space<vmem>>, vector<1x4x12x8xf32>
    %3 = vector.shape_cast %2 : vector<1x4x12x8xf32> to vector<4x12x8xf32>
    "tpu.trace_start"() <{level = 10 : i32, message = "htd,hsd->hts"}> : () -> ()
    %cst = arith.constant dense<0.000000e+00> : vector<4x8x12xf32>
    %4 = tpu.matmul %1, %3, %cst {dimension_numbers = #tpu.dot_dimension_numbers<[2], [2], [1], [1], [0, 0, 0, 1, 1, 1], [0], [0]>} : vector<4x8x8xf32>, vector<4x12x8xf32>, vector<4x8x12xf32> -> vector<4x8x12xf32>
    %cst_7 = arith.constant 0xFF800000 : f32
    "tpu.trace_stop"() : () -> ()
    %5 = vector.broadcast %cst_7 : f32 to vector<1x1x1xf32>
    %6 = vector.shape_cast %4 : vector<4x8x12xf32> to vector<1x4x8x12xf32>
    %cst_8 = arith.constant dense<0xFF800000> : vector<1xf32>
    %7 = vector.multi_reduction <maximumf>, %6, %cst_8 [1, 2, 3] : vector<1x4x8x12xf32> to vector<1xf32>
    %8 = vector.shape_cast %7 : vector<1xf32> to vector<1x1x1x1xf32>
    %9 = vector.extract %8[0, 0, 0, 0] : f32 from vector<1x1x1x1xf32>
    %10 = vector.broadcast %9 : f32 to vector<1x1x1xf32>
    %11 = arith.maximumf %5, %10 : vector<1x1x1xf32>
    %c0_9 = arith.constant 0 : index
    %c0_10 = arith.constant 0 : index
    %c0_11 = arith.constant 0 : index
    %12 = vector.load %arg3[%c0_9, %c0_10, %c0_11] : memref<1x1x1xf32, #tpu.memory_space<vmem>>, vector<1x1x1xf32>
    tpu.vector_store %arg3[%c0_9, %c0_10, %c0_11], %11 {strides = array<i32>} : memref<1x1x1xf32, #tpu.memory_space<vmem>>, vector<1x1x1xf32>,
    return
  }
  func.func @transform_0(%arg0: i32) -> (i32, i32, i32, i32) {
    %c0_i32 = arith.constant 0 : i32
    %c0_i32_0 = arith.constant 0 : i32
    %c0_i32_1 = arith.constant 0 : i32
    %c0_i32_2 = arith.constant 0 : i32
    return %arg0, %c0_i32, %c0_i32_0, %c0_i32_1 : i32, i32, i32, i32
  }
  func.func @transform_1(%arg0: i32) -> (i32, i32, i32, i32) {
    %c0_i32 = arith.constant 0 : i32
    %c0_i32_0 = arith.constant 0 : i32
    %c0_i32_1 = arith.constant 0 : i32
    %c0_i32_2 = arith.constant 0 : i32
    return %arg0, %c0_i32, %c0_i32_0, %c0_i32_1 : i32, i32, i32, i32
  }
  func.func @transform_2(%arg0: i32) -> (i32, i32, i32) {
    %c0_i32 = arith.constant 0 : i32
    %c0_i32_0 = arith.constant 0 : i32
    %c0_i32_1 = arith.constant 0 : i32
    return %arg0, %c0_i32, %c0_i32_0 : i32, i32, i32
  }
}

module attributes {stable_mosaic.version = 11 : i64} {
  func.func @_attn_kernel(%arg0: i32, %arg1: i32, %arg2: memref<1x1xf32, #tpu.memory_space<smem>>, %arg3: memref<1x1x8x8xf32, #tpu.memory_space<vmem>>, %arg4: memref<1x1x12x8xf32, #tpu.memory_space<vmem>>, %arg5: memref<1x1x8x8xf32, #tpu.memory_space<vmem>>, %arg6: memref<1x1x12x8xf32, #tpu.memory_space<vmem>>, %arg7: memref<1x8x16xf32, #tpu.memory_space<vmem>>, %arg8: memref<1x16xf32, #tpu.memory_space<vmem>>, %arg9: memref<1x8x24xf32, #tpu.memory_space<vmem>>, %arg10: memref<1x24xf32, #tpu.memory_space<vmem>>, %arg11: memref<1x8x16xf32, #tpu.memory_space<vmem>>, %arg12: memref<1x12x24xf32, #tpu.memory_space<vmem>>) attributes {dimension_semantics = [#tpu.dimension_semantics<parallel>, #tpu.dimension_semantics<arbitrary>], iteration_bounds = array<i64: 2, 4>, scalar_prefetch = 0 : i64, scratch_operands = 0 : i64, tpu.core_type = #tpu.core_type<tc>, window_params = [{transform_indices = @transform_0, window_bounds = array<i64: 1, 1>}, {transform_indices = @transform_1, window_bounds = array<i64: 1, 1, 8, 8>}, {transform_indices = @transform_2, window_bounds = array<i64: 1, 1, 12, 8>}, {transform_indices = @transform_3, window_bounds = array<i64: 1, 1, 8, 8>}, {transform_indices = @transform_4, window_bounds = array<i64: 1, 1, 12, 8>}, {transform_indices = @transform_5, window_bounds = array<i64: 1, 8, 16>}, {pipeline_mode = #tpu.pipeline_mode<synchronous>, transform_indices = @transform_6, window_bounds = array<i64: 1, 16>}, {transform_indices = @transform_7, window_bounds = array<i64: 1, 8, 24>}, {pipeline_mode = #tpu.pipeline_mode<synchronous>, transform_indices = @transform_8, window_bounds = array<i64: 1, 24>}, {transform_indices = @transform_9, window_bounds = array<i64: 1, 8, 16>}, {transform_indices = @transform_10, window_bounds = array<i64: 1, 12, 24>}]} {
    %c0 = arith.constant 0 : index
    %c0_0 = arith.constant 0 : index
    %0 = memref.load %arg2[%c0, %c0_0] : memref<1x1xf32, #tpu.memory_space<smem>>
    %c0_1 = arith.constant 0 : index
    %c0_2 = arith.constant 0 : index
    %c0_3 = arith.constant 0 : index
    %c0_4 = arith.constant 0 : index
    %1 = vector.load %arg3[%c0_1, %c0_2, %c0_3, %c0_4] : memref<1x1x8x8xf32, #tpu.memory_space<vmem>>, vector<1x1x8x8xf32>
    %2 = vector.shape_cast %1 : vector<1x1x8x8xf32> to vector<8x8xf32>
    %c0_5 = arith.constant 0 : index
    %c0_6 = arith.constant 0 : index
    %c0_7 = arith.constant 0 : index
    %c0_8 = arith.constant 0 : index
    %3 = vector.load %arg4[%c0_5, %c0_6, %c0_7, %c0_8] : memref<1x1x12x8xf32, #tpu.memory_space<vmem>>, vector<1x1x12x8xf32>
    %4 = vector.shape_cast %3 : vector<1x1x12x8xf32> to vector<12x8xf32>
    %c0_9 = arith.constant 0 : index
    %c0_10 = arith.constant 0 : index
    %c0_11 = arith.constant 0 : index
    %c0_12 = arith.constant 0 : index
    %5 = vector.load %arg5[%c0_9, %c0_10, %c0_11, %c0_12] : memref<1x1x8x8xf32, #tpu.memory_space<vmem>>, vector<1x1x8x8xf32>
    %6 = vector.shape_cast %5 : vector<1x1x8x8xf32> to vector<8x8xf32>
    %c0_13 = arith.constant 0 : index
    %c0_14 = arith.constant 0 : index
    %c0_15 = arith.constant 0 : index
    %c0_16 = arith.constant 0 : index
    %7 = vector.load %arg6[%c0_13, %c0_14, %c0_15, %c0_16] : memref<1x1x12x8xf32, #tpu.memory_space<vmem>>, vector<1x1x12x8xf32>
    %8 = vector.shape_cast %7 : vector<1x1x12x8xf32> to vector<12x8xf32>
    %cst = arith.constant dense<0.000000e+00> : vector<8x12xf32>
    %9 = tpu.matmul %2, %4, %cst {dimension_numbers = #tpu.dot_dimension_numbers<[1], [1], [0], [0], [0, 0, 1, 0], [], []>} : vector<8x8xf32>, vector<12x8xf32>, vector<8x12xf32> -> vector<8x12xf32>
    %10 = vector.broadcast %0 : f32 to vector<8x12xf32>
    %11 = arith.subf %9, %10 : vector<8x12xf32>
    %cst_17 = arith.constant -5.000000e+04 : f32
    %12 = vector.broadcast %cst_17 : f32 to vector<8x12xf32>
    %13 = arith.maximumf %11, %12 : vector<8x12xf32>
    %cst_18 = arith.constant dense<0xFF800000> : vector<8xf32>
    %14 = vector.multi_reduction <maximumf>, %13, %cst_18 [1] : vector<8x12xf32> to vector<8xf32>
    %15 = vector.shape_cast %14 : vector<8xf32> to vector<8x1xf32>
    %16 = vector.broadcast %15 : vector<8x1xf32> to vector<8x12xf32>
    %17 = arith.subf %13, %16 : vector<8x12xf32>
    %18 = math.exp %17 : vector<8x12xf32>
    %cst_19 = arith.constant dense<0.000000e+00> : vector<8xf32>
    %19 = vector.multi_reduction <add>, %18, %cst_19 [1] : vector<8x12xf32> to vector<8xf32>
    %20 = vector.shape_cast %19 : vector<8xf32> to vector<8x1xf32>
    %21 = vector.broadcast %20 : vector<8x1xf32> to vector<8x12xf32>
    %22 = arith.divf %18, %21 : vector<8x12xf32>
    %cst_20 = arith.constant dense<0xFF800000> : vector<12xf32>
    %23 = vector.multi_reduction <maximumf>, %13, %cst_20 [0] : vector<8x12xf32> to vector<12xf32>
    %24 = vector.shape_cast %23 : vector<12xf32> to vector<1x12xf32>
    %25 = vector.broadcast %24 : vector<1x12xf32> to vector<8x12xf32>
    %26 = arith.subf %13, %25 : vector<8x12xf32>
    %cst_21 = arith.constant -5.000000e+04 : f32
    %27 = vector.broadcast %cst_21 : f32 to vector<8x12xf32>
    %28 = arith.maximumf %26, %27 : vector<8x12xf32>
    %29 = math.exp %28 : vector<8x12xf32>
    %cst_22 = arith.constant dense<0.000000e+00> : vector<12xf32>
    %30 = vector.multi_reduction <add>, %29, %cst_22 [0] : vector<8x12xf32> to vector<12xf32>
    %31 = vector.shape_cast %30 : vector<12xf32> to vector<1x12xf32>
    %32 = vector.broadcast %31 : vector<1x12xf32> to vector<8x12xf32>
    %33 = arith.divf %29, %32 : vector<8x12xf32>
    %cst_23 = arith.constant dense<0.000000e+00> : vector<8x8xf32>
    %34 = tpu.matmul %22, %8, %cst_23 {dimension_numbers = #tpu.dot_dimension_numbers<[1], [0], [0], [1], [0, 0, 1, 1], [], []>} : vector<8x12xf32>, vector<12x8xf32>, vector<8x8xf32> -> vector<8x8xf32>
    %cst_24 = arith.constant dense<0.000000e+00> : vector<12x8xf32>
    %35 = tpu.matmul %33, %6, %cst_24 {dimension_numbers = #tpu.dot_dimension_numbers<[0], [0], [1], [1], [0, 1, 1, 1], [], []>} : vector<8x12xf32>, vector<8x8xf32>, vector<12x8xf32> -> vector<12x8xf32>
    %c0_25 = arith.constant 0 : index
    %c0_26 = arith.constant 0 : index
    %c0_27 = arith.constant 0 : index
    %36 = vector.load %arg7[%c0_25, %c0_26, %c0_27] : memref<1x8x16xf32, #tpu.memory_space<vmem>>, vector<1x8x16xf32>
    %37 = vector.shape_cast %36 : vector<1x8x16xf32> to vector<8x16xf32>
    %cst_28 = arith.constant dense<0.000000e+00> : vector<8x16xf32>
    %38 = tpu.matmul %34, %37, %cst_28 {dimension_numbers = #tpu.dot_dimension_numbers<[1], [0], [0], [1], [0, 0, 1, 1], [], []>} : vector<8x8xf32>, vector<8x16xf32>, vector<8x16xf32> -> vector<8x16xf32>
    %c0_29 = arith.constant 0 : index
    %c0_30 = arith.constant 0 : index
    %c0_31 = arith.constant 0 : index
    %39 = vector.load %arg9[%c0_29, %c0_30, %c0_31] : memref<1x8x24xf32, #tpu.memory_space<vmem>>, vector<1x8x24xf32>
    %40 = vector.shape_cast %39 : vector<1x8x24xf32> to vector<8x24xf32>
    %cst_32 = arith.constant dense<0.000000e+00> : vector<12x24xf32>
    %41 = tpu.matmul %35, %40, %cst_32 {dimension_numbers = #tpu.dot_dimension_numbers<[1], [0], [0], [1], [0, 0, 1, 1], [], []>} : vector<12x8xf32>, vector<8x24xf32>, vector<12x24xf32> -> vector<12x24xf32>
    %c0_i32 = arith.constant 0 : i32
    %42 = arith.cmpi eq, %arg1, %c0_i32 : i32
    %43 = arith.extui %42 : i1 to i32
    %c0_i32_33 = arith.constant 0 : i32
    %44 = arith.cmpi ne, %43, %c0_i32_33 : i32
    scf.if %44 {
      %c0_36 = arith.constant 0 : index
      %c0_37 = arith.constant 0 : index
      %48 = vector.load %arg8[%c0_36, %c0_37] : memref<1x16xf32, #tpu.memory_space<vmem>>, vector<1x16xf32>
      %49 = vector.broadcast %48 : vector<1x16xf32> to vector<8x16xf32>
      %50 = arith.addf %49, %38 : vector<8x16xf32>
      %c0_38 = arith.constant 0 : index
      %c0_39 = arith.constant 0 : index
      %c0_40 = arith.constant 0 : index
      %51 = vector.load %arg11[%c0_38, %c0_39, %c0_40] : memref<1x8x16xf32, #tpu.memory_space<vmem>>, vector<1x8x16xf32>
      %52 = vector.shape_cast %51 : vector<1x8x16xf32> to vector<8x16xf32>
      %53 = vector.shape_cast %50 : vector<8x16xf32> to vector<1x8x16xf32>
      tpu.vector_store %arg11[%c0_38, %c0_39, %c0_40], %53 {strides = array<i32>} : memref<1x8x16xf32, #tpu.memory_space<vmem>>, vector<1x8x16xf32>,
      %c0_41 = arith.constant 0 : index
      %c0_42 = arith.constant 0 : index
      %54 = vector.load %arg10[%c0_41, %c0_42] : memref<1x24xf32, #tpu.memory_space<vmem>>, vector<1x24xf32>
      %55 = vector.broadcast %54 : vector<1x24xf32> to vector<12x24xf32>
      %56 = arith.addf %55, %41 : vector<12x24xf32>
      %c0_43 = arith.constant 0 : index
      %c0_44 = arith.constant 0 : index
      %c0_45 = arith.constant 0 : index
      %57 = vector.load %arg12[%c0_43, %c0_44, %c0_45] : memref<1x12x24xf32, #tpu.memory_space<vmem>>, vector<1x12x24xf32>
      %58 = vector.shape_cast %57 : vector<1x12x24xf32> to vector<12x24xf32>
      %59 = vector.shape_cast %56 : vector<12x24xf32> to vector<1x12x24xf32>
      tpu.vector_store %arg12[%c0_43, %c0_44, %c0_45], %59 {strides = array<i32>} : memref<1x12x24xf32, #tpu.memory_space<vmem>>, vector<1x12x24xf32>,
    } else {
    }
    %c0_i32_34 = arith.constant 0 : i32
    %45 = arith.cmpi sgt, %arg1, %c0_i32_34 : i32
    %46 = arith.extui %45 : i1 to i32
    %c0_i32_35 = arith.constant 0 : i32
    %47 = arith.cmpi ne, %46, %c0_i32_35 : i32
    scf.if %47 {
      %c0_36 = arith.constant 0 : index
      %c0_37 = arith.constant 0 : index
      %c0_38 = arith.constant 0 : index
      %48 = vector.load %arg11[%c0_36, %c0_37, %c0_38] : memref<1x8x16xf32, #tpu.memory_space<vmem>>, vector<1x8x16xf32>
      %49 = vector.shape_cast %48 : vector<1x8x16xf32> to vector<8x16xf32>
      %50 = arith.addf %49, %38 : vector<8x16xf32>
      %c0_39 = arith.constant 0 : index
      %c0_40 = arith.constant 0 : index
      %c0_41 = arith.constant 0 : index
      %51 = vector.load %arg11[%c0_39, %c0_40, %c0_41] : memref<1x8x16xf32, #tpu.memory_space<vmem>>, vector<1x8x16xf32>
      %52 = vector.shape_cast %51 : vector<1x8x16xf32> to vector<8x16xf32>
      %53 = vector.shape_cast %50 : vector<8x16xf32> to vector<1x8x16xf32>
      tpu.vector_store %arg11[%c0_39, %c0_40, %c0_41], %53 {strides = array<i32>} : memref<1x8x16xf32, #tpu.memory_space<vmem>>, vector<1x8x16xf32>,
      %c0_42 = arith.constant 0 : index
      %c0_43 = arith.constant 0 : index
      %c0_44 = arith.constant 0 : index
      %54 = vector.load %arg12[%c0_42, %c0_43, %c0_44] : memref<1x12x24xf32, #tpu.memory_space<vmem>>, vector<1x12x24xf32>
      %55 = vector.shape_cast %54 : vector<1x12x24xf32> to vector<12x24xf32>
      %56 = arith.addf %55, %41 : vector<12x24xf32>
      %c0_45 = arith.constant 0 : index
      %c0_46 = arith.constant 0 : index
      %c0_47 = arith.constant 0 : index
      %57 = vector.load %arg12[%c0_45, %c0_46, %c0_47] : memref<1x12x24xf32, #tpu.memory_space<vmem>>, vector<1x12x24xf32>
      %58 = vector.shape_cast %57 : vector<1x12x24xf32> to vector<12x24xf32>
      %59 = vector.shape_cast %56 : vector<12x24xf32> to vector<1x12x24xf32>
      tpu.vector_store %arg12[%c0_45, %c0_46, %c0_47], %59 {strides = array<i32>} : memref<1x12x24xf32, #tpu.memory_space<vmem>>, vector<1x12x24xf32>,
    } else {
    }
    return
  }
  func.func @transform_0(%arg0: i32, %arg1: i32) -> (i32, i32) {
    %c0_i32 = arith.constant 0 : i32
    %c0_i32_0 = arith.constant 0 : i32
    %c0_i32_1 = arith.constant 0 : i32
    return %c0_i32, %c0_i32_0 : i32, i32
  }
  func.func @transform_1(%arg0: i32, %arg1: i32) -> (i32, i32, i32, i32) {
    %c0_i32 = arith.constant 0 : i32
    %c0_i32_0 = arith.constant 0 : i32
    %c0_i32_1 = arith.constant 0 : i32
    return %arg0, %arg1, %c0_i32, %c0_i32_0 : i32, i32, i32, i32
  }
  func.func @transform_2(%arg0: i32, %arg1: i32) -> (i32, i32, i32, i32) {
    %c0_i32 = arith.constant 0 : i32
    %c0_i32_0 = arith.constant 0 : i32
    %c0_i32_1 = arith.constant 0 : i32
    return %arg0, %arg1, %c0_i32, %c0_i32_0 : i32, i32, i32, i32
  }
  func.func @transform_3(%arg0: i32, %arg1: i32) -> (i32, i32, i32, i32) {
    %c0_i32 = arith.constant 0 : i32
    %c0_i32_0 = arith.constant 0 : i32
    %c0_i32_1 = arith.constant 0 : i32
    return %arg0, %arg1, %c0_i32, %c0_i32_0 : i32, i32, i32, i32
  }
  func.func @transform_4(%arg0: i32, %arg1: i32) -> (i32, i32, i32, i32) {
    %c0_i32 = arith.constant 0 : i32
    %c0_i32_0 = arith.constant 0 : i32
    %c0_i32_1 = arith.constant 0 : i32
    return %arg0, %arg1, %c0_i32, %c0_i32_0 : i32, i32, i32, i32
  }
  func.func @transform_5(%arg0: i32, %arg1: i32) -> (i32, i32, i32) {
    %c0_i32 = arith.constant 0 : i32
    %c0_i32_0 = arith.constant 0 : i32
    %c0_i32_1 = arith.constant 0 : i32
    return %arg1, %c0_i32, %c0_i32_0 : i32, i32, i32
  }
  func.func @transform_6(%arg0: i32, %arg1: i32) -> (i32, i32) {
    %c0_i32 = arith.constant 0 : i32
    %c0_i32_0 = arith.constant 0 : i32
    %c0_i32_1 = arith.constant 0 : i32
    return %c0_i32, %c0_i32_0 : i32, i32
  }
  func.func @transform_7(%arg0: i32, %arg1: i32) -> (i32, i32, i32) {
    %c0_i32 = arith.constant 0 : i32
    %c0_i32_0 = arith.constant 0 : i32
    %c0_i32_1 = arith.constant 0 : i32
    return %arg1, %c0_i32, %c0_i32_0 : i32, i32, i32
  }
  func.func @transform_8(%arg0: i32, %arg1: i32) -> (i32, i32) {
    %c0_i32 = arith.constant 0 : i32
    %c0_i32_0 = arith.constant 0 : i32
    %c0_i32_1 = arith.constant 0 : i32
    return %c0_i32, %c0_i32_0 : i32, i32
  }
  func.func @transform_9(%arg0: i32, %arg1: i32) -> (i32, i32, i32) {
    %c0_i32 = arith.constant 0 : i32
    %c0_i32_0 = arith.constant 0 : i32
    %c0_i32_1 = arith.constant 0 : i32
    return %arg0, %c0_i32, %c0_i32_0 : i32, i32, i32
  }
  func.func @transform_10(%arg0: i32, %arg1: i32) -> (i32, i32, i32) {
    %c0_i32 = arith.constant 0 : i32
    %c0_i32_0 = arith.constant 0 : i32
    %c0_i32_1 = arith.constant 0 : i32
    return %arg0, %c0_i32, %c0_i32_0 : i32, i32, i32
  }
}

</mosaic_0001>

<bundles_post_ra>
// kernel: state_mha_forward.5
= control target key start
LH: loop header
LB: loop body
LE: loop exit
PB: predicated region body
PF: predicated region fallthrough
CT: control target
= control target key end

     0   :  { %v158_v0 = vmov 0.0   ;;  %vm27_vm0 = vcmask 195584   ;;  %vm159_vm1 = vmmov 0   ;;  %vm117_vm2 = vcmask 523264   ;;  %s210_s1 = inlined_call_operand.vmem [shape: f32[24,64], index: 1, kind: input, shape index: {}]   ;;  %s211_s0 = inlined_call_operand.vmem [shape: f32[24,24], index: 0, kind: input, shape index: {}]   ;;  %s212_s2 = inlined_call_operand.vmem [shape: f32[1,64], index: 2, kind: input, shape index: {}]   ;;  %s213_s3 = inlined_call_operand.vmem [shape: f32[24,64], index: 3, kind: output, shape index: {}]  }
   0x1   :  { %150 = vmatprep.subr.mxu1 %v158_v0  ;;  %v19_v1 = vld [vmem:[%s210_s1 + $0x10] sm:$0xff]  ;;  %135 = vmatprep.subr.mxu0 %v158_v0  ;;  %v18_v2 = vld [vmem:[%s210_s1 + $0x8] sm:$0xff]  ;;  %v17_v3 = vld [vmem:[%s210_s1] sm:$0xff] }
   0x2   :  { %153 = vmatpush3.msra.mxu1 %v19_v1  ;;  %136 = vmatpush3.msra.mxu0 %v19_v1  ;;  %v15_v4 = vld [vmem:[%s211_s0 + $0x8] sm:$0xff]  ;;  %v14_v5 = vld [vmem:[%s211_s0] sm:$0xff]  ;;  %v16_v6 = vld [vmem:[%s211_s0 + $0x10] sm:$0xff] }
   0x3   :  { %151 = vmatprep.subr.mxu1 %v158_v0  ;;  %137 = vmatprep.subr.mxu0 %v158_v0  ;;  %v125_v7 = vld [vmem:[%s212_s2] ss:$0 sm:$0xff] }
   0x4   :  { %154 = vmatpush3.msra.mxu1 %v18_v2  ;;  %138 = vmatpush3.msra.mxu0 %v18_v2 }
   0x5   :  { %152 = vmatprep.subr.mxu1 %v158_v0  ;;  %144 = vmatprep.mubr.msk.f32.mxu1 %vm159_vm1, %v158_v0 }
   0x6   :  { %155 = vmatpush3.msra.mxu1 %v17_v3  ;;  %139 = vmatprep.subr.mxu0 %v158_v0 }
   0x7   :  { %145 = vmatmul.mubr.msk.f32.vlgmr.msra.gmra.mxu1 %vm27_vm0, %v15_v4  ;;  %140 = vmatpush3.msra.mxu0 %v17_v3 }
   0x8   :  { %141 = vmatprep.mubr.msk.f32.mxu0 %vm159_vm1, %v158_v0  ;;  %147 = vmatprep.mubr.msk.f32.mxu1 %vm159_vm1, %v158_v0 }
   0x9   :  { %142 = vmatmul.mubr.msk.f32.vlgmr.msra.gmra.mxu0 %vm27_vm0, %v14_v5 }
   0xb   :  { %148 = vmatmul.mubr.msk.f32.gmra.mxu1 %vm27_vm0, %v16_v6 }
  0xc7   :  { %v108_v8 = vpop.f32.mrf.mxu1 }
  0xc8   :  { %v109_v9 = vadd.f32 %v125_v7, %v108_v8 }
  0xc9   :  { %v103_v10 = vpop.f32.mrf.mxu0  ;;  %v146_v11 = vpop.f32.mrf.mxu1 }
  0xca   :  { %119 = vst.msk [vmem:[%s213_s3 + $0x8] sm:$0xff] %vm117_vm2, %v109_v9  ;;  %v104_v12 = vadd.f32 %v125_v7, %v103_v10 }
  0xcb   :  { %v143_v13 = vpop.f32.mrf.mxu0  ;;  %v113_v14 = vpop.f32.mrf.mxu1 }
  0xcc   :  { %118 = vst.msk [vmem:[%s213_s3] sm:$0xff] %vm117_vm2, %v104_v12  ;;  %v114_v15 = vadd.f32 %v125_v7, %v113_v14 }
  0xcd   :  { %v149_v16 = vpop.f32.mrf.mxu1 }
  0xce   :  { %120 = vst.msk [vmem:[%s213_s3 + $0x10] sm:$0xff] %vm117_vm2, %v114_v15 }

// kernel: state_mha_forward.4
= control target key start
LH: loop header
LB: loop body
LE: loop exit
PB: predicated region body
PF: predicated region fallthrough
CT: control target
= control target key end

     0   :  { %vm25_vm0 = vcmask 130048   ;;  %vm107_vm1 = vcmask 523264   ;;  %s169_s1 = inlined_call_operand.vmem [shape: f32[16,64], index: 1, kind: input, shape index: {}]   ;;  %s170_s0 = inlined_call_operand.vmem [shape: f32[16,16], index: 0, kind: input, shape index: {}]   ;;  %s171_s2 = inlined_call_operand.vmem [shape: f32[1,64], index: 2, kind: input, shape index: {}]   ;;  %s172_s3 = inlined_call_operand.vmem [shape: f32[16,64], index: 3, kind: output, shape index: {}]  }
   0x1   :  { %v17_v0 = vld [vmem:[%s169_s1 + $0x8] sm:$0xff]  ;;  %v16_v1 = vld [vmem:[%s169_s1] sm:$0xff] }
   0x2   :  { %v14_v2 = vld [vmem:[%s170_s0] sm:$0xff]  ;;  %121 = vmatprep.subr.mxu0 %v17_v0  ;;  %v15_v3 = vld [vmem:[%s170_s0 + $0x8] sm:$0xff] }
   0x3   :  { %125 = vmatprep.mubr.msk.f32.mxu0 %vm25_vm0, %v14_v2  ;;  %122 = vmatpush3.msra.mxu0 %v17_v0  ;;  %v114_v4 = vld [vmem:[%s171_s2] ss:$0 sm:$0xff] }
   0x4   :  { %123 = vmatprep.subr.mxu0 %v16_v1 }
   0x5   :  { %124 = vmatpush3.msra.mxu0 %v16_v1 }
   0x6   :  { %126 = vmatmul.mubr.msk.f32.vlgmr.msra.gmra.mxu0 %vm25_vm0, %v15_v3 }
  0xc6   :  { %v127_v5 = vpop.f32.mrf.mxu0 }
  0xc7   :  { %v104_v6 = vadd.f32 %v127_v5, %v114_v4 }
  0xc8   :  { %v98_v7 = vpop.f32.mrf.mxu0 }
  0xc9   :  { %109 = vst.msk [vmem:[%s172_s3 + $0x8] sm:$0xff] %vm107_vm1, %v104_v6  ;;  %v99_v8 = vadd.f32 %v114_v4, %v98_v7 }
  0xcb   :  { %108 = vst.msk [vmem:[%s172_s3] sm:$0xff] %vm107_vm1, %v99_v8 }

// kernel: state_mha_forward.6
= control target key start
LH: loop header
LB: loop body
LE: loop exit
PB: predicated region body
PF: predicated region fallthrough
CT: control target
= control target key end

     0   :  { %s670_s9 = smov 0   ;;  %s711_s0 = inlined_call_operand.vmem [shape: f32[2,4,8,8], index: 0, kind: input, shape index: {}]   ;;  %s712_s1 = inlined_call_operand.vmem [shape: f32[2,4,12,8], index: 1, kind: input, shape index: {}]   ;;  %s713_s2 = inlined_call_operand.vmem [shape: f32[2,1,1], index: 2, kind: output, shape index: {}]  }
   0x1 LB: > { %s568_s10 = sadd.s32 4294967295, %s651_s9   ;;  %p572_p0 = scmp.ge.s32.totalorder %s651_s9, 1  ;;  %s651_s9 = sphi %s670_s9, %s12_s9  }
   0x2   : > { %p122_p1 = scmp.lt.s32.totalorder %s651_s9, 3 }
   0x4   : > { %p123_p2 = pnand %p572_p0, %p122_p1 }
   0x5   : > { %p147_p3 = scmp.lt.s32.totalorder (!%p123_p2), %s568_s10, 1 }
   0x6   : > { %126 = sbr.rel (%p123_p2) target bundleno = 430 (0x1ae), region = 28 }
   0xb   : > { %v653_v0 = vmov 0.0   ;;  %s715_s10 = smov (!%p147_p3, %s568_s10), 1  ;;  %vm654_vm0 = vmmov 0   ;;  %vm172_vm1 = vcmask 64512   ;;  %vm489_vm2 = vcmask 97280  }
   0xc   : > { %605 = vmatprep.subr.mxu0 %v653_v0  ;;  %612 = vmatprep.subr.mxu1 %v653_v0  ;;  %s592_s11 = sshll.u32 %s715_s10, 6  ;;  %s591_s15 = sshll.u32 %s715_s10, 5  ;;  %vm507_vm3 = vcmask 0  }
   0xd   : > { %609 = vmatprep.mubr.msk.f32.mxu0 %vm654_vm0, %v653_v0  ;;  %616 = vmatprep.mubr.msk.f32.mxu1 %vm654_vm0, %v653_v0  ;;  %s156_s14 = scalar_lea.vmem %s712_s1, %s592_s11  ;;  %s151_s18 = scalar_lea.vmem %s711_s0, %s591_s15 }
   0xe   : > { %v165_v1 = vld [vmem:[%s156_s14 + $0x8] sm:$0xf]  ;;  %v167_v2 = vld [vmem:[%s156_s14 + $0x18] sm:$0xf]  ;;  %v164_v3 = vld [vmem:[%s156_s14] sm:$0xff]  ;;  %s159_s21 = scalar_lea.vmem %s713_s2, %s715_s10 }
   0xf   : > { %606 = vmatpush3.xpose.msk.msra.mxu0 %vm172_vm1, %v165_v1  ;;  %613 = vmatpush3.xpose.msk.msra.mxu1 %vm172_vm1, %v167_v2  ;;  %v166_v4 = vld [vmem:[%s156_s14 + $0x10] sm:$0xff]  ;;  %v160_v5 = vld [vmem:[%s151_s18] sm:$0xff]  ;;  %v161_v6 = vld [vmem:[%s151_s18 + $0x8] sm:$0xff] }
  0x10   : > { %607 = vmatprep.subr.mxu0 %v653_v0  ;;  %614 = vmatprep.subr.mxu1 %v653_v0  ;;  %v169_v7 = vld [vmem:[%s156_s14 + $0x28] sm:$0xf]  ;;  %v171_v8 = vld [vmem:[%s156_s14 + $0x38] sm:$0xf]  ;;  %v168_v9 = vld [vmem:[%s156_s14 + $0x20] sm:$0xff] }
  0x11   : > { %v170_v10 = vld [vmem:[%s156_s14 + $0x30] sm:$0xff]  ;;  %v163_v12 = vld [vmem:[%s151_s18 + $0x18] sm:$0xff] }
  0x12   : > { %v162_v11 = vld [vmem:[%s151_s18 + $0x10] sm:$0xff] }
  0x13   : > { %608 = vmatpush3.xpose.msk.msra.mxu0 %vm172_vm1, %v164_v3  ;;  %615 = vmatpush3.xpose.msk.msra.mxu1 %vm172_vm1, %v166_v4 }
  0x14   : > { %619 = vmatprep.subr.mxu0 %v653_v0  ;;  %626 = vmatprep.subr.mxu1 %v653_v0 }
  0x16   : > { %610 = vmatmul.mubr.msk.f32.vlgmr.msra.gmra.mxu0 %vm172_vm1, %v160_v5  ;;  %617 = vmatmul.mubr.msk.f32.vlgmr.msra.gmra.mxu1 %vm172_vm1, %v161_v6 }
  0x17   : > { %620 = vmatpush3.xpose.msk.msra.mxu0 %vm172_vm1, %v169_v7  ;;  %627 = vmatpush3.xpose.msk.msra.mxu1 %vm172_vm1, %v171_v8 }
  0x18   : > { %621 = vmatprep.subr.mxu0 %v653_v0  ;;  %628 = vmatprep.subr.mxu1 %v653_v0 }
  0x19   : > { %623 = vmatprep.mubr.msk.f32.mxu0 %vm654_vm0, %v653_v0  ;;  %630 = vmatprep.mubr.msk.f32.mxu1 %vm654_vm0, %v653_v0 }
  0x1b   : > { %622 = vmatpush3.xpose.msk.msra.mxu0 %vm172_vm1, %v168_v9  ;;  %629 = vmatpush3.xpose.msk.msra.mxu1 %vm172_vm1, %v170_v10 }
  0x1e   : > { %624 = vmatmul.mubr.msk.f32.vlgmr.msra.gmra.mxu0 %vm172_vm1, %v162_v11  ;;  %631 = vmatmul.mubr.msk.f32.vlgmr.msra.gmra.mxu1 %vm172_vm1, %v163_v12 }
  0xd6   : > { %v248_v13 = vpop.f32.mrf.mxu0  ;;  %v327_v14 = vpop.f32.mrf.mxu1 }
  0xd7   : > { %v490_v17 = vsel %vm489_vm2, %v248_v13, -inf  ;;  %v491_v18 = vsel %vm489_vm2, %v327_v14, -inf }
  0xd8   : > { %v611_v15 = vpop.f32.mrf.mxu0  ;;  %v618_v16 = vpop.f32.mrf.mxu1  ;;  %v494_v23 = vmax.f32 %v490_v17, %v491_v18 }
  0xde   : > { %v406_v19 = vpop.f32.mrf.mxu0  ;;  %v485_v20 = vpop.f32.mrf.mxu1 }
  0xdf   : > { %v492_v21 = vsel %vm489_vm2, %v406_v19, -inf  ;;  %v493_v22 = vsel %vm489_vm2, %v485_v20, -inf }
  0xe0   : > { %v495_v24 = vmax.f32 %v492_v21, %v493_v22  ;;  %v625_v25 = vpop.f32.mrf.mxu0  ;;  %v632_v26 = vpop.f32.mrf.mxu1 }
  0xe2   : > { %v496_v27 = vmax.f32 %v494_v23, %v495_v24 }
  0xe4   : > { %497 = vmax.xlane.f32.xlu0 %v496_v27 }
 0x16d   : > { %v498_v28 = vpop.xlane.xlu0 %497 }
 0x16e   : > { %v499_v29 = vrot.slane %v498_v28, 4 }
 0x170   : > { %v500_v30 = vmax.f32 %v498_v28, %v499_v29 }
 0x172   : > { %v501_v31 = vrot.slane %v500_v30, 2 }
 0x174   : > { %v502_v32 = vmax.f32 %v500_v30, %v501_v31 }
 0x176   : > { %v503_v33 = vrot.slane %v502_v32, 1 }
 0x178   : > { %v504_v34 = vmax.f32 %v502_v32, %v503_v33 }
 0x17a   : > { %633 = vpush %v504_v34 }
 0x1ab   : > { %s634_s22 = spop %633 }
 0x1ac   : > { %v506_v35 = vstv %s634_s22 }
 0x1ad   : > { %508 = vst.msk [vmem:[%s159_s21] sm:$0x1] %vm507_vm3, %v506_v35 }
 0x1ae PF: > { %s12_s9 = sadd.s32 1, %s651_s9  }
 0x1af   : > { %p9_p4 = scmp.ge.s32.totalorder %s12_s9, 4  }
 0x1b1   :  { %11 = sbr.rel (!%p9_p4) target bundleno = 1 (0x1), region = 61 }

// kernel: state_mha_forward.7
= control target key start
LH: loop header
LB: loop body
LE: loop exit
PB: predicated region body
PF: predicated region fallthrough
CT: control target
= control target key end

     0   :  { %s1455_s15 = smov 0   ;;  %s1457_s16 = smov 0   ;;  %s1591_s0 = inlined_call_operand.<no memory space> [shape: f32[1,1], index: 0, kind: input, shape index: {}]   ;;  %s1592_s1 = inlined_call_operand.vmem [shape: f32[2,4,8,8], index: 1, kind: input, shape index: {}]   ;;  %s1593_s2 = inlined_call_operand.vmem [shape: f32[2,4,12,8], index: 2, kind: input, shape index: {}]   ;;  %s1594_s3 = inlined_call_operand.vmem [shape: f32[2,4,8,8], index: 3, kind: input, shape index: {}]   ;;  %s1595_s4 = inlined_call_operand.vmem [shape: f32[2,4,12,8], index: 4, kind: input, shape index: {}]   ;;  %s1596_s5 = inlined_call_operand.vmem [shape: f32[4,8,16], index: 5, kind: input, shape index: {}]   ;;  %s1597_s6 = inlined_call_operand.vmem [shape: f32[1,16], index: 6, kind: input, shape index: {}]   ;;  %s1598_s7 = inlined_call_operand.vmem [shape: f32[4,8,24], index: 7, kind: input, shape index: {}]   ;;  %s1599_s8 = inlined_call_operand.vmem [shape: f32[1,24], index: 8, kind: input, shape index: {}]   ;;  %s1600_s9 = inlined_call_operand.vmem [shape: f32[2,8,16], index: 9, kind: output, shape index: {0}]   ;;  %s1601_s10 = inlined_call_operand.vmem [shape: f32[2,12,24], index: 10, kind: output, shape index: {1}]  }
   0x1   :  { %16 = sst [smem:[#allocation2]] %s1591_s0  ;;  %s1459_s17 = smov 0  }
   0x2   :  { %s1461_s18 = smov 0   ;;  %s1463_s19 = smov 0  }
   0x3 LB: > { %s31_s0 = sadd.s32 1, %s1385_s17  ;;  %s34_s20 = sadd.s32 1, %s1389_s18  ;;  %s1393_s19 = sphi %s1463_s19, %s22_s19   ;;  %s1389_s18 = sphi %s1461_s18, %s1609_s18   ;;  %s1385_s17 = sphi %s1459_s17, %s1608_s17   ;;  %s1381_s16 = sphi %s1457_s16, %s1607_s16   ;;  %s1377_s15 = sphi %s1455_s15, %s1606_s15  }
   0x4   : > { %p32_p0 = scmp.ge.s32.totalorder %s31_s0, 4  ;;  %p1229_p1 = scmp.ge.s32.totalorder %s1393_s19, 1 }
   0x5   : > { %p398_p2 = scmp.lt.s32.totalorder %s1393_s19, 9 }
   0x6   : > { %s1611_s0 = smov (%p32_p0, %s31_s0), 0  ;;  %s1613_s20 = smov (!%p32_p0, %s34_s20), %s1389_s18 }
   0x7   : > { %1602 = sst [smem:[#allocation3_spill]] %s1611_s0  ;;  %p399_p3 = pnand %p1229_p1, %p398_p2 }
   0x8   : > { %p36_p4 = scmp.ge.s32.totalorder %s1613_s20, 2  ;;  %p477_p5 = scmp.lt.s32.totalorder (!%p399_p3), %s1381_s16, 1 }
   0x9   : > { %402 = sbr.rel (%p399_p3) target bundleno = 952 (0x3b8), region = 56  ;;  %p479_p6 = scmp.lt.s32.totalorder (!%p399_p3), %s1377_s15, 3 }
   0xa   : > { %s1615_s20 = smov (%p36_p4, %s1613_s20), 0  ;;  %p1255_p7 = scmp.ne.s32.totalorder (!%p399_p3), %s1377_s15, 0 }
   0xb   : > { %1603 = sst [smem:[#allocation4_spill]] %s1615_s20 }
   0xc   : > { %s528_s20 = sld [smem:[#allocation2]] (!%p399_p3) }
   0xe   : > { %v1395_v0 = vmov 0.0   ;;  %vm1396_vm0 = vmmov 0   ;;  %s1617_s16 = smov (!%p477_p5, %s1381_s16), 1  ;;  %vm535_vm1 = vcmask 64512   ;;  %vm618_vm2 = vcmask 97280  }
   0xf   : > { %1276 = vmatprep.subr.mxu0 %v1395_v0  ;;  %1280 = vmatprep.mubr.msk.f32.mxu0 %vm1396_vm0, %v1395_v0  ;;  %s1495_s21 = scalar_select %p479_p6, %s1377_s15, 3  ;;  %vm652_vm3 = vcmask 1043456  }
  0x10   : > { %1283 = vmatprep.subr.mxu1 %v1395_v0  ;;  %1287 = vmatprep.mubr.msk.f32.mxu1 %vm1396_vm0, %v1395_v0  ;;  %s1233_s22 = sshll.u32 %s1617_s16, 3  ;;  %s1261_s23 = sshll.u32 %s1617_s16, 4 }
  0x11   : > { %s1232_s24 = sshll.u32 %s1495_s21, 1  ;;  %s1501_s27 = scalar_lea.vmem %s1600_s9, %s1233_s22 }
  0x12   : > { %s1503_s28 = sadd.s32 %s1233_s22, %s1232_s24  ;;  %s1508_s11 = scalar_lea.vmem %s1601_s10, %s1261_s23  ;;  %v615_v4 = vstv %s528_s20 }
  0x13   : > { %s1234_s12 = sshll.u32 %s1503_s28, 3  ;;  %s1230_s13 = sshll.u32 %s1617_s16, 2 }
  0x14   : > { %s493_s0 = scalar_lea.vmem %s1593_s2, %s1234_s12  ;;  %s1517_s25 = sadd.s32 %s1230_s13, %s1495_s21 }
  0x15   : > { %v531_v1 = vld [vmem:[%s493_s0 + $0x8] sm:$0xf]  ;;  %s1231_s22 = sshll.u32 %s1517_s25, 3  ;;  %v530_v2 = vld [vmem:[%s493_s0] sm:$0xff]  ;;  %s510_s29 = scalar_lea.vmem %s1595_s4, %s1234_s12 }
  0x16   : > { %1277 = vmatpush3.xpose.msk.msra.mxu0 %vm535_vm1, %v531_v1  ;;  %s484_s16 = scalar_lea.vmem %s1592_s1, %s1231_s22  ;;  %s501_s14 = scalar_lea.vmem %s1594_s3, %s1231_s22  ;;  %v534_v34 = vld [vmem:[%s510_s29 + $0x8] sm:$0xf]  ;;  %v533_v35 = vld [vmem:[%s510_s29] sm:$0xff] }
  0x17   : > { %1278 = vmatprep.subr.mxu0 %v1395_v0  ;;  %v529_v3 = vld [vmem:[%s484_s16] sm:$0xff]  ;;  %1284 = vmatpush3.msk.msra.mxu1 %vm652_vm3, %v534_v34  ;;  %s1240_s28 = sshll.u32 %s1495_s21, 3 }
  0x18   : > { %v532_v36 = vld [vmem:[%s501_s14] sm:$0xff]  ;;  %1285 = vmatprep.subr.mxu1 %v1395_v0  ;;  %s514_s22 = scalar_lea.vmem %s1596_s5, %s1240_s28  ;;  %s518_s16 = scalar_lea.vmem %s1598_s7, %s1240_s28 }
  0x19   : > { %1286 = vmatpush3.msra.mxu1 %v533_v35  ;;  %v839_v42 = vld [vmem:[%s514_s22] sm:$0xff] }
  0x1a   : > { %1279 = vmatpush3.xpose.msk.msra.mxu0 %vm535_vm1, %v530_v2  ;;  %1290 = vmatprep.subr.mxu1 %v532_v36  ;;  %v913_v43 = vld [vmem:[%s518_s16] sm:$0xff] }
  0x1b   : > { %1295 = vmatprep.subr.mxu0 %v1395_v0 }
  0x1d   : > { %1281 = vmatmul.mubr.msk.f32.vlgmr.msra.gmra.mxu0 %vm535_vm1, %v529_v3 }
  0x1e   : > { %1297 = vmatprep.mubr.msk.f32.mxu0 %vm1396_vm0, %v1395_v0  ;;  %1296 = vmatpush3.msra.mxu0 %v839_v42 }
  0xdd   : > { %v611_v5 = vpop.f32.mrf.mxu0 }
  0xde   : > { %v616_v6 = vsub.f32 %v611_v5, %v615_v4 }
  0xdf   : > { %v1282_v7 = vpop.f32.mrf.mxu0 }
  0xe0   : > { %v617_v8 = vmax.f32 %v616_v6, -50000.0 }
  0xe2   : > { %v619_v9 = vsel %vm618_vm2, %v617_v8, -inf }
  0xe3   : > { %620 = vmax.xlane.f32.xlu0 %v619_v9  ;;  %v630_v10 = vrot.slane %v619_v9, 4 }
  0xe5   : > { %v631_v11 = vmax.f32 %v619_v9, %v630_v10 }
  0xe7   : > { %v632_v12 = vrot.slane %v631_v11, 2 }
  0xe9   : > { %v633_v13 = vmax.f32 %v631_v11, %v632_v12 }
  0xeb   : > { %v634_v14 = vrot.slane %v633_v13, 1 }
  0xed   : > { %v635_v15 = vmax.f32 %v633_v13, %v634_v14 }
  0xef   : > { %v636_v16 = vsub.f32 %v617_v8, %v635_v15 }
  0xf1   : > { %v637_v17 = vmax.f32 %v636_v16, -50000.0 }
  0xf3   : > { %v638_v18 = vmul.f32 1.442695, %v637_v17 }
  0xf5   : > { %1347 = vpow2.f32 %v638_v18 }
 0x102   : > { %v1348_v19 = vpop.eup %1347 }
 0x103   : > { %v640_v20 = vsel %vm618_vm2, %v1348_v19, 0.0 }
 0x104   : > { %v641_v21 = vrot.slane %v640_v20, 4 }
 0x106   : > { %v642_v22 = vadd.f32 %v641_v21, %v640_v20 }
 0x108   : > { %v643_v23 = vrot.slane %v642_v22, 2 }
 0x10a   : > { %v644_v24 = vadd.f32 %v643_v23, %v642_v22 }
 0x10c   : > { %v645_v25 = vrot.slane %v644_v24, 1 }
 0x10e   : > { %v646_v26 = vadd.f32 %v645_v25, %v644_v24 }
 0x110   : > { %1349 = vrcp.f32 %v646_v26 }
 0x11d   : > { %v1350_v27 = vpop.eup %1349 }
 0x11e   : > { %v648_v28 = vmul.f32 %v1350_v27, %v1348_v19 }
 0x120   : > { %726 = vxpose.xlu1.b32.start.end [1/1] (short) (narrow) %v648_v28, 16 }
 0x16c   : > { %v621_v29 = vpop.xlane.xlu0 %620 }
 0x16d   : > { %v622_v30 = vsub.f32 %v617_v8, %v621_v29 }
 0x16f   : > { %v623_v31 = vmul.f32 1.442695, %v622_v30 }
 0x171   : > { %1351 = vpow2.f32 %v623_v31 }
 0x17e   : > { %v1352_v32 = vpop.eup %1351 }
 0x17f   : > { %v625_v33 = vsel %vm618_vm2, %v1352_v32, 0.0 }
 0x180   : > { %626 = vadd.xlane.f32.xlu0 %v625_v33 }
 0x19c   : > { %v742_v38 = vpop.trf.xlu1 }
 0x1a0   : > { %v743_v41 = vpop.trf.xlu1 }
 0x209   : > { %v627_v37 = vpop.xlane.xlu0 %626 }
 0x20a   : > { %1353 = vrcp.f32 %v627_v37 }
 0x217   : > { %v1354_v39 = vpop.eup %1353 }
 0x218   : > { %v629_v40 = vmul.f32 %v1354_v39, %v1352_v32 }
 0x21a   : > { %1288 = vmatmul.mubr.msk.f32.vlgmr.msra.gmra.mxu1 %vm618_vm2, %v629_v40 }
 0x21b   : > { %1291 = vmatpush3.msra.mxu1 %v532_v36  ;;  %1292 = vmatprep.mubr.msk.f32.mxu1 %vm535_vm1, %v742_v38 }
 0x21c   : > { %1300 = vmatprep.subr.mxu1 %v913_v43 }
 0x21e   : > { %1293 = vmatmul.mubr.msk.f32.vlgmr.msra.gmra.mxu1 %vm535_vm1, %v743_v41 }
 0x21f   : > { %1301 = vmatpush3.msra.mxu1 %v913_v43 }
 0x2da   : > { %v722_v44 = vpop.f32.mrf.mxu1 }
 0x2db   : > { %1298 = vmatmul.mubr.msk.f32.vlgmr.msra.gmra.mxu0 %vm535_vm1, %v722_v44 }
 0x2dc   : > { %v1289_v45 = vpop.f32.mrf.mxu1 }
 0x2de   : > { %v1294_v46 = vpop.f32.mrf.mxu1 }
 0x2e0   : > { %v830_v47 = vpop.f32.mrf.mxu1 }
 0x2e1   : > { %1302 = vmatprep.mubr.msk.f32.mxu1 %vm535_vm1, %v830_v47 }
 0x2e2   : > { %1303 = vmatmul.mubr.msk.f32.vlgmr.msra.gmra.mxu1 %vm535_vm1, %v1294_v46 }
 0x39b   : > { %v909_v48 = vpop.f32.mrf.mxu0 }
 0x39d   : > { %v1299_v49 = vpop.f32.mrf.mxu0 }
 0x3a0   : > { %998 = sbr.rel (%p1255_p7) target bundleno = 939 (0x3ab), region = 60 }
 0x3a2   : > { %v1304_v50 = vpop.f32.mrf.mxu1 }
 0x3a4   : > { %v986_v51 = vpop.f32.mrf.mxu1 }
 0x3a5   : > { %v1256_v52 = vld [vmem:[%s1597_s6] ss:$0 sm:$0xff]  ;;  %vm1007_vm4 = vcmask 130048   ;;  %vm1018_vm5 = vcmask 195584   ;;  %vm1020_vm6 = vcmask 191488  }
 0x3a6   : > { %v1257_v53 = vld [vmem:[%s1599_s8] ss:$0 sm:$0xff]  ;;  %v1006_v54 = vadd.f32 %v1256_v52, %v909_v48 }
 0x3a7   : > { %v1016_v55 = vadd.f32 %v1257_v53, %v986_v51  ;;  %v1017_v56 = vadd.f32 %v1304_v50, %v1257_v53 }
 0x3a8   : > { %1008 = vst.msk [vmem:[%s1501_s27] sm:$0xff] %vm1007_vm4, %v1006_v54 }
 0x3a9   : > { %1019 = vst.msk [vmem:[%s1508_s11] sm:$0xff] %vm1018_vm5, %v1016_v55 }
 0x3aa   : > { %1021 = vst.msk [vmem:[%s1508_s11 + $0x8] sm:$0xf] %vm1020_vm6, %v1017_v56 }
 0x3ab PF: > { %p1258_p8 = scmp.le.s32.totalorder %s1377_s15, 0 }
 0x3ad   : > { %1025 = sbr.rel (%p1258_p8) target bundleno = 952 (0x3b8), region = 64 }
 0x3b2   : > { %v1026_v57 = vld [vmem:[%s1501_s27] sm:$0xff]  ;;  %vm1028_vm7 = vcmask 130048   ;;  %vm1034_vm8 = vcmask 195584   ;;  %v1031_v59 = vld [vmem:[%s1508_s11 + $0x8] sm:$0xf]  ;;  %vm1036_vm9 = vcmask 191488  }
 0x3b3   : > { %v1030_v58 = vld [vmem:[%s1508_s11] sm:$0xff]  ;;  %v1027_v60 = vadd.f32 %v1026_v57, %v909_v48  ;;  %v1033_v62 = vadd.f32 %v1304_v50, %v1031_v59 }
 0x3b4   : > { %v1032_v61 = vadd.f32 %v1030_v58, %v986_v51 }
 0x3b5   : > { %1029 = vst.msk [vmem:[%s1501_s27] sm:$0xff] %vm1028_vm7, %v1027_v60 }
 0x3b6   : > { %1035 = vst.msk [vmem:[%s1508_s11] sm:$0xff] %vm1034_vm8, %v1032_v61 }
 0x3b7   : > { %1037 = vst.msk [vmem:[%s1508_s11 + $0x8] sm:$0xf] %vm1036_vm9, %v1033_v62 }
 0x3b8 PF: > { %s22_s19 = sadd.s32 1, %s1393_s19   ;;  %s1604_s29 = sld [smem:[#allocation3_spill]] }
 0x3b9   : > { %p19_p9 = scmp.ge.s32.totalorder %s22_s19, 10   ;;  %s1605_s30 = sld [smem:[#allocation4_spill]] }
 0x3ba   : > { %s1606_s15 = smov %s1385_s17  ;;  %s1607_s16 = smov %s1389_s18 }
 0x3bb   :  { %21 = sbr.rel (!%p19_p9) target bundleno = 3 (0x3), region = 121 }
 0x3be   : > { %s1608_s17 = smov %s1604_s29 }
 0x3bf   : > { %s1609_s18 = smov %s1605_s30 }

</bundles_post_ra>
